<compile_context>
chip_gen: v7x
topology: tpu7x:2x2x1
jax: 0.10.0
libtpu: 0.0.40
codegen_flags: <defaults>
</compile_context>

<pallas_src>
import functools

import jax
import jax.numpy as jnp
from jax.experimental import pallas as pl
from jax.experimental.pallas import tpu as pltpu

LANE = 128     # TPU lane width: pad all feature dims to this
SUBLANE = 8    # f32 sublane


def _round_up(n, m):
    return ((n + m - 1) // m) * m


def mlp_kernel(x_ref, w1_ref, b1_ref, w2_ref, b2_ref, w3_ref, b3_ref, o_ref, *, out_size):
    # bf16 MXU operands, f32 accumulation; activation/softmax math in f32.
    x = x_ref[...]                                                        # [tile_b, in_p] bf16
    h1 = jnp.dot(x, w1_ref[...], preferred_element_type=jnp.float32) + b1_ref[...]
    h1 = jax.nn.sigmoid(h1)                                               # f32

    h2 = jnp.dot(h1.astype(jnp.bfloat16), w2_ref[...],
                 preferred_element_type=jnp.float32) + b2_ref[...]
    h2 = jax.nn.sigmoid(h2)                                               # f32

    logits = jnp.dot(h2.astype(jnp.bfloat16), w3_ref[...],
                     preferred_element_type=jnp.float32) + b3_ref[...]    # [tile_b, out_p] f32

    # Mask padded output lanes so they do not corrupt the softmax normalization.
    lane = jax.lax.broadcasted_iota(jnp.int32, logits.shape, 1)
    logits = jnp.where(lane < out_size, logits, -jnp.inf)

    m = jnp.max(logits, axis=-1, keepdims=True)
    e = jnp.exp(logits - m)
    denom = jnp.sum(e, axis=-1, keepdims=True)
    o_ref[...] = (e * pl.reciprocal(denom, approx=True)).astype(o_ref.dtype)


def mlp_forward(x, w1, b1, w2, b2, w3, b3, *, tile_b=256):
    """x: [B, in]; w_i: [in_i, out_i] (transposed vs. PyTorch); b_i: [out_i] or [1, out_i]."""
    B, in_size = x.shape
    h1_size, h2_size, out_size = w1.shape[1], w2.shape[1], w3.shape[1]

    # Pad every feature dim to a full 128-lane tile. Zero-padding is semantics-preserving:
    # padded hidden lanes feed zero weight rows downstream; padded logit lanes are masked
    # to -inf inside the kernel before softmax.
    in_p = _round_up(in_size, LANE)
    h1_p = _round_up(h1_size, LANE)
    h2_p = _round_up(h2_size, LANE)
    out_p = _round_up(out_size, LANE)

    # Batch tile: multiple of the f32 sublane, capped (default 256) so f32 intermediates
    # stay in vregs rather than spilling; clamp down for tiny batches.
    tile_b = min(tile_b, _round_up(B, SUBLANE))
    tile_b = _round_up(tile_b, SUBLANE)
    b_p = _round_up(B, tile_b)

    def pad2(a, rows, cols, dtype):
        a = a.reshape((1, -1)) if a.ndim == 1 else a
        out = jnp.zeros((rows, cols), dtype)
        return out.at[: a.shape[0], : a.shape[1]].set(a.astype(dtype))

    x_p = pad2(x, b_p, in_p, jnp.bfloat16)
    w1_p = pad2(w1, in_p, h1_p, jnp.bfloat16)
    w2_p = pad2(w2, h1_p, h2_p, jnp.bfloat16)
    w3_p = pad2(w3, h2_p, out_p, jnp.bfloat16)
    b1_p = pad2(b1, 1, h1_p, jnp.float32)
    b2_p = pad2(b2, 1, h2_p, jnp.float32)
    b3_p = pad2(b3, 1, out_p, jnp.float32)

    def resident(a):
        # Whole (small, KB-scale) weight/bias stays in VMEM across all batch tiles.
        return pl.BlockSpec(a.shape, lambda i: (0,) * a.ndim)

    out_padded = pl.pallas_call(
        functools.partial(mlp_kernel, out_size=out_size),
        out_shape=jax.ShapeDtypeStruct((b_p, out_p), jnp.float32),
        grid=(b_p // tile_b,),
        in_specs=[
            pl.BlockSpec((tile_b, in_p), lambda i: (i, 0)),
            resident(w1_p), resident(b1_p),
            resident(w2_p), resident(b2_p),
            resident(w3_p), resident(b3_p),
        ],
        out_specs=pl.BlockSpec((tile_b, out_p), lambda i: (i, 0)),
        compiler_params=pltpu.CompilerParams(
            dimension_semantics=("parallel",),  # shards batch tiles across v7x's 2 TCs
        ),
    )(x_p, w1_p, b1_p, w2_p, b2_p, w3_p, b3_p)

    return out_padded[:B, :out_size]


def init_linear_params(key, in_features, out_features):
    """Deterministic init mimicking nn.Linear (uniform +/- 1/sqrt(in))."""
    kw, kb = jax.random.split(key)
    bound = 1.0 / jnp.sqrt(jnp.float32(in_features))
    # PyTorch stores weight as [out, in]; we keep the transposed [in, out] for the kernel.
    w = jax.random.uniform(kw, (in_features, out_features), jnp.float32, -bound, bound)
    b = jax.random.uniform(kb, (1, out_features), jnp.float32, -bound, bound)
    return w, b


if __name__ == "__main__":
    # Small shapes consistent with the module's forward.
    batch = 8
    input_size, hidden_size1, hidden_size2, output_size = 32, 64, 32, 16

    key = jax.random.PRNGKey(0)
    kx, k1, k2, k3 = jax.random.split(key, 4)

    x = jax.random.normal(kx, (batch, input_size), jnp.float32)
    w1, b1 = init_linear_params(k1, input_size, hidden_size1)
    w2, b2 = init_linear_params(k2, hidden_size1, hidden_size2)
    w3, b3 = init_linear_params(k3, hidden_size2, output_size)

    out = mlp_forward(x, w1, b1, w2, b2, w3, b3)
    out = jax.block_until_ready(out)

    # Reference check in plain JAX (f32). bf16 matmul operands loosen the tolerance.
    h1 = jax.nn.sigmoid(x @ w1 + b1)
    h2 = jax.nn.sigmoid(h1 @ w2 + b2)
    ref = jax.nn.softmax(h2 @ w3 + b3, axis=-1)
    assert out.shape == (batch, output_size)
    assert bool(jnp.all(jnp.isfinite(out)))
    assert jnp.allclose(out, ref, atol=3e-2)
    assert jnp.allclose(jnp.sum(out, axis=-1), 1.0, atol=1e-2)

    print("KERNEL_OK")
</pallas_src>

<mosaic_0001>
module attributes {stable_mosaic.version = 11 : i64} {
  func.func @mlp_kernel(%arg0: i32, %arg1: memref<8x128xbf16, #tpu.memory_space<vmem>>, %arg2: memref<128x128xbf16, #tpu.memory_space<vmem>>, %arg3: memref<1x128xf32, #tpu.memory_space<vmem>>, %arg4: memref<128x128xbf16, #tpu.memory_space<vmem>>, %arg5: memref<1x128xf32, #tpu.memory_space<vmem>>, %arg6: memref<128x128xbf16, #tpu.memory_space<vmem>>, %arg7: memref<1x128xf32, #tpu.memory_space<vmem>>, %arg8: memref<8x128xf32, #tpu.memory_space<vmem>>) attributes {dimension_semantics = [#tpu.dimension_semantics<parallel>], iteration_bounds = array<i64: 1>, scalar_prefetch = 0 : i64, scratch_operands = 0 : i64, tpu.core_type = #tpu.core_type<tc>, window_params = [{transform_indices = @transform_0, window_bounds = array<i64: 8, 128>}, {pipeline_mode = #tpu.pipeline_mode<synchronous>, transform_indices = @transform_1, window_bounds = array<i64: 128, 128>}, {pipeline_mode = #tpu.pipeline_mode<synchronous>, transform_indices = @transform_2, window_bounds = array<i64: 1, 128>}, {pipeline_mode = #tpu.pipeline_mode<synchronous>, transform_indices = @transform_3, window_bounds = array<i64: 128, 128>}, {pipeline_mode = #tpu.pipeline_mode<synchronous>, transform_indices = @transform_4, window_bounds = array<i64: 1, 128>}, {pipeline_mode = #tpu.pipeline_mode<synchronous>, transform_indices = @transform_5, window_bounds = array<i64: 128, 128>}, {pipeline_mode = #tpu.pipeline_mode<synchronous>, transform_indices = @transform_6, window_bounds = array<i64: 1, 128>}, {transform_indices = @transform_7, window_bounds = array<i64: 8, 128>}]} {
    %c0 = arith.constant 0 : index
    %c0_0 = arith.constant 0 : index
    %0 = vector.load %arg1[%c0, %c0_0] : memref<8x128xbf16, #tpu.memory_space<vmem>>, vector<8x128xbf16>
    %c0_1 = arith.constant 0 : index
    %c0_2 = arith.constant 0 : index
    %1 = vector.load %arg2[%c0_1, %c0_2] : memref<128x128xbf16, #tpu.memory_space<vmem>>, vector<128x128xbf16>
    %cst = arith.constant dense<0.000000e+00> : vector<8x128xf32>
    %2 = tpu.matmul %0, %1, %cst {dimension_numbers = #tpu.dot_dimension_numbers<[1], [0], [0], [1], [0, 0, 1, 1], [], []>} : vector<8x128xbf16>, vector<128x128xbf16>, vector<8x128xf32> -> vector<8x128xf32>
    %c0_3 = arith.constant 0 : index
    %c0_4 = arith.constant 0 : index
    %3 = vector.load %arg3[%c0_3, %c0_4] : memref<1x128xf32, #tpu.memory_space<vmem>>, vector<1x128xf32>
    %4 = vector.broadcast %3 : vector<1x128xf32> to vector<8x128xf32>
    %5 = arith.addf %2, %4 : vector<8x128xf32>
    %6 = arith.negf %5 : vector<8x128xf32>
    %7 = math.exp %6 : vector<8x128xf32>
    %cst_5 = arith.constant 1.000000e+00 : f32
    %8 = vector.broadcast %cst_5 : f32 to vector<8x128xf32>
    %9 = arith.addf %8, %7 : vector<8x128xf32>
    %10 = arith.divf %8, %9 : vector<8x128xf32>
    %11 = arith.truncf %10 : vector<8x128xf32> to vector<8x128xbf16>
    %c0_6 = arith.constant 0 : index
    %c0_7 = arith.constant 0 : index
    %12 = vector.load %arg4[%c0_6, %c0_7] : memref<128x128xbf16, #tpu.memory_space<vmem>>, vector<128x128xbf16>
    %cst_8 = arith.constant dense<0.000000e+00> : vector<8x128xf32>
    %13 = tpu.matmul %11, %12, %cst_8 {dimension_numbers = #tpu.dot_dimension_numbers<[1], [0], [0], [1], [0, 0, 1, 1], [], []>} : vector<8x128xbf16>, vector<128x128xbf16>, vector<8x128xf32> -> vector<8x128xf32>
    %c0_9 = arith.constant 0 : index
    %c0_10 = arith.constant 0 : index
    %14 = vector.load %arg5[%c0_9, %c0_10] : memref<1x128xf32, #tpu.memory_space<vmem>>, vector<1x128xf32>
    %15 = vector.broadcast %14 : vector<1x128xf32> to vector<8x128xf32>
    %16 = arith.addf %13, %15 : vector<8x128xf32>
    %17 = arith.negf %16 : vector<8x128xf32>
    %18 = math.exp %17 : vector<8x128xf32>
    %cst_11 = arith.constant 1.000000e+00 : f32
    %19 = vector.broadcast %cst_11 : f32 to vector<8x128xf32>
    %20 = arith.addf %19, %18 : vector<8x128xf32>
    %21 = arith.divf %19, %20 : vector<8x128xf32>
    %22 = arith.truncf %21 : vector<8x128xf32> to vector<8x128xbf16>
    %c0_12 = arith.constant 0 : index
    %c0_13 = arith.constant 0 : index
    %23 = vector.load %arg6[%c0_12, %c0_13] : memref<128x128xbf16, #tpu.memory_space<vmem>>, vector<128x128xbf16>
    %cst_14 = arith.constant dense<0.000000e+00> : vector<8x128xf32>
    %24 = tpu.matmul %22, %23, %cst_14 {dimension_numbers = #tpu.dot_dimension_numbers<[1], [0], [0], [1], [0, 0, 1, 1], [], []>} : vector<8x128xbf16>, vector<128x128xbf16>, vector<8x128xf32> -> vector<8x128xf32>
    %c0_15 = arith.constant 0 : index
    %c0_16 = arith.constant 0 : index
    %25 = vector.load %arg7[%c0_15, %c0_16] : memref<1x128xf32, #tpu.memory_space<vmem>>, vector<1x128xf32>
    %26 = vector.broadcast %25 : vector<1x128xf32> to vector<8x128xf32>
    %27 = arith.addf %24, %26 : vector<8x128xf32>
    %28 = tpu.iota {dimensions = array<i32: 1>} : vector<8x128xi32>
    %c16_i32 = arith.constant 16 : i32
    %29 = vector.broadcast %c16_i32 : i32 to vector<8x128xi32>
    %30 = arith.cmpi slt, %28, %29 : vector<8x128xi32>
    %cst_17 = arith.constant 0xFF800000 : f32
    %31 = vector.broadcast %cst_17 : f32 to vector<8x128xf32>
    %32 = arith.select %30, %27, %31 : vector<8x128xi1>, vector<8x128xf32>
    %cst_18 = arith.constant dense<0xFF800000> : vector<8xf32>
    %33 = vector.multi_reduction <maximumf>, %32, %cst_18 [1] : vector<8x128xf32> to vector<8xf32>
    %34 = vector.shape_cast %33 : vector<8xf32> to vector<8x1xf32>
    %35 = vector.broadcast %34 : vector<8x1xf32> to vector<8x128xf32>
    %36 = arith.subf %32, %35 : vector<8x128xf32>
    %37 = math.exp %36 : vector<8x128xf32>
    %cst_19 = arith.constant dense<0.000000e+00> : vector<8xf32>
    %38 = vector.multi_reduction <add>, %37, %cst_19 [1] : vector<8x128xf32> to vector<8xf32>
    %39 = vector.shape_cast %38 : vector<8xf32> to vector<8x1xf32>
    %40 = tpu.reciprocal %39 {approx = true} : vector<8x1xf32> -> vector<8x1xf32>
    %41 = vector.broadcast %40 : vector<8x1xf32> to vector<8x128xf32>
    %42 = arith.mulf %37, %41 : vector<8x128xf32>
    %c0_20 = arith.constant 0 : index
    %c0_21 = arith.constant 0 : index
    %43 = vector.load %arg8[%c0_20, %c0_21] : memref<8x128xf32, #tpu.memory_space<vmem>>, vector<8x128xf32>
    tpu.vector_store %arg8[%c0_20, %c0_21], %42 {strides = array<i32>} : memref<8x128xf32, #tpu.memory_space<vmem>>, vector<8x128xf32>,
    return
  }
  func.func @transform_0(%arg0: i32) -> (i32, i32) {
    %c0_i32 = arith.constant 0 : i32
    %c0_i32_0 = arith.constant 0 : i32
    return %arg0, %c0_i32 : i32, i32
  }
  func.func @transform_1(%arg0: i32) -> (i32, i32) {
    %c0_i32 = arith.constant 0 : i32
    %c0_i32_0 = arith.constant 0 : i32
    %c0_i32_1 = arith.constant 0 : i32
    return %c0_i32, %c0_i32_0 : i32, i32
  }
  func.func @transform_2(%arg0: i32) -> (i32, i32) {
    %c0_i32 = arith.constant 0 : i32
    %c0_i32_0 = arith.constant 0 : i32
    %c0_i32_1 = arith.constant 0 : i32
    return %c0_i32, %c0_i32_0 : i32, i32
  }
  func.func @transform_3(%arg0: i32) -> (i32, i32) {
    %c0_i32 = arith.constant 0 : i32
    %c0_i32_0 = arith.constant 0 : i32
    %c0_i32_1 = arith.constant 0 : i32
    return %c0_i32, %c0_i32_0 : i32, i32
  }
  func.func @transform_4(%arg0: i32) -> (i32, i32) {
    %c0_i32 = arith.constant 0 : i32
    %c0_i32_0 = arith.constant 0 : i32
    %c0_i32_1 = arith.constant 0 : i32
    return %c0_i32, %c0_i32_0 : i32, i32
  }
  func.func @transform_5(%arg0: i32) -> (i32, i32) {
    %c0_i32 = arith.constant 0 : i32
    %c0_i32_0 = arith.constant 0 : i32
    %c0_i32_1 = arith.constant 0 : i32
    return %c0_i32, %c0_i32_0 : i32, i32
  }
  func.func @transform_6(%arg0: i32) -> (i32, i32) {
    %c0_i32 = arith.constant 0 : i32
    %c0_i32_0 = arith.constant 0 : i32
    %c0_i32_1 = arith.constant 0 : i32
    return %c0_i32, %c0_i32_0 : i32, i32
  }
  func.func @transform_7(%arg0: i32) -> (i32, i32) {
    %c0_i32 = arith.constant 0 : i32
    %c0_i32_0 = arith.constant 0 : i32
    return %arg0, %c0_i32 : i32, i32
  }
}

</mosaic_0001>

<bundles_post_ra>
// kernel: tpu_custom_call.1
= control target key start
LH: loop header
LB: loop body
LE: loop exit
PB: predicated region body
PF: predicated region fallthrough
CT: control target
= control target key end

     0   :  { %12 = vsyncpa [#allocation3], 0  ;;  %s896_s0 = inlined_call_operand.hbm [shape: bf16[8,128], index: 0, kind: input, shape index: {}]   ;;  %s897_s1 = inlined_call_operand.hbm [shape: bf16[128,128], index: 1, kind: input, shape index: {}]   ;;  %s898_s2 = inlined_call_operand.vmem [shape: f32[1,128], index: 2, kind: input, shape index: {}]   ;;  %s899_s3 = inlined_call_operand.hbm [shape: bf16[128,128], index: 3, kind: input, shape index: {}]   ;;  %s900_s4 = inlined_call_operand.vmem [shape: f32[1,128], index: 4, kind: input, shape index: {}]   ;;  %s901_s5 = inlined_call_operand.hbm [shape: bf16[128,128], index: 5, kind: input, shape index: {}]   ;;  %s902_s6 = inlined_call_operand.vmem [shape: f32[1,128], index: 6, kind: input, shape index: {}]   ;;  %s903_s7 = inlined_call_operand.hbm [shape: f32[8,128], index: 7, kind: output, shape index: {}]  }
   0x1   :  { %13 = vsyncpa [#allocation6], 0 }
   0x2   :  { %14 = vsyncpa [#allocation9], 0 }
   0x3   :  { %15 = vsyncpa [#allocation4], 0  ;;  %s739_s24 = smov [#allocation5]   ;;  %s621_s28 = scalar_lea.hbm %s897_s1, 1024 }
   0x4   :  { %s31_s25 = sshll.u32 %s739_s24, 4  ;;  %p622_p0 = scmp.ne.s32.totalorder %s897_s1, %s621_s28  ;;  %s32_s25 = int_to_ptr.vmem [resolvable:$true] %s31_s25 }
   0x5   :  { %p625_p1 = scmp.lt.u32.totalorder %s621_s28, %s897_s1 }
   0x7   :  { %p627_p2 = pnand %p625_p1, %p622_p0 }
   0x9   :  { %630 = shalt.err (!%p627_p2)
}
   0xa   :  { %s631_s10 = scalar_lea.vmem %s32_s25, 1024  ;;  %p636_p4 = scmp.lt.s32.totalorder %s32_s25, %s32_s25 }
   0xb   :  { %p632_p3 = scmp.ne.s32.totalorder %s32_s25, %s631_s10  ;;  %p637_p5 = scmp.lt.s32.totalorder %s631_s10, %s631_s10 }
   0xd   :  { %p638_p6 = por %p637_p5, %p636_p4 }
   0xf   :  { %p639_p7 = pnand %p638_p6, %p632_p3 }
  0x11   :  { %642 = shalt.err (!%p639_p7)
}
  0x12   :  { %s740_s11 = smov 64   ;;  %s741_s12 = smov 4  }
  0x13   :  { %37 = dma.hbm_to_vmem [thread:$0]  %s897_s1, 1024, %s32_s25, [#allocation6], %s740_s11, %s740_s11, %s741_s12  }
  0x14   :  { %s742_s15 = smov [#allocation2]   ;;  %s743_s17 = smov [#allocation7]  }
  0x15   :  { %s22_s16 = sshll.u32 %s742_s15, 4  ;;  %s45_s18 = sshll.u32 %s743_s17, 4  ;;  %s23_s16 = int_to_ptr.vmem [resolvable:$true] %s22_s16  ;;  %s46_s18 = int_to_ptr.vmem [resolvable:$true] %s45_s18 }
  0x16   :  { %s643_s21 = scalar_lea.hbm %s896_s0, 64 }
  0x17   :  { %p644_p8 = scmp.ne.s32.totalorder %s896_s0, %s643_s21  ;;  %p647_p9 = scmp.lt.u32.totalorder %s643_s21, %s896_s0 }
  0x19   :  { %p649_p10 = pnand %p647_p9, %p644_p8 }
  0x1b   :  { %652 = shalt.err (!%p649_p10)
}
  0x1c   :  { %s653_s1 = scalar_lea.vmem %s23_s16, 64  ;;  %p658_p12 = scmp.lt.s32.totalorder %s23_s16, %s23_s16 }
  0x1d   :  { %p654_p11 = scmp.ne.s32.totalorder %s23_s16, %s653_s1  ;;  %p659_p13 = scmp.lt.s32.totalorder %s653_s1, %s653_s1 }
  0x1f   :  { %p660_p0 = por %p659_p13, %p658_p12 }
  0x21   :  { %p661_p1 = pnand %p660_p0, %p654_p11 }
  0x23   :  { %664 = shalt.err (!%p661_p1)
}
  0x24   :  { %25 = dma.hbm_to_vmem [thread:$0]  %s896_s0, 64, %s23_s16, [#allocation3]  }
  0x25   :  { %s665_s30 = scalar_lea.hbm %s899_s3, 1024 }
  0x26   :  { %p666_p2 = scmp.ne.s32.totalorder %s899_s3, %s665_s30  ;;  %p669_p3 = scmp.lt.u32.totalorder %s665_s30, %s899_s3 }
  0x28   :  { %p671_p4 = pnand %p669_p3, %p666_p2 }
  0x2a   :  { %674 = shalt.err (!%p671_p4)
}
  0x2b   :  { %s675_s14 = scalar_lea.vmem %s46_s18, 1024  ;;  %p680_p6 = scmp.lt.s32.totalorder %s46_s18, %s46_s18 }
  0x2c   :  { %p676_p5 = scmp.ne.s32.totalorder %s46_s18, %s675_s14  ;;  %p681_p7 = scmp.lt.s32.totalorder %s675_s14, %s675_s14 }
  0x2e   :  { %p682_p8 = por %p681_p7, %p680_p6 }
  0x30   :  { %p683_p9 = pnand %p682_p8, %p676_p5 }
  0x32   :  { %686 = shalt.err (!%p683_p9)
}
  0x33   :  { %51 = dma.hbm_to_vmem [thread:$0]  %s899_s3, 1024, %s46_s18, [#allocation6], %s740_s11, %s740_s11, %s741_s12  }
  0x34   :  { %s744_s16 = smov [#allocation8]   ;;  %s687_s21 = scalar_lea.hbm %s901_s5, 1024 }
  0x35   :  { %s59_s17 = sshll.u32 %s744_s16, 4  ;;  %p688_p10 = scmp.ne.s32.totalorder %s901_s5, %s687_s21  ;;  %s60_s17 = int_to_ptr.vmem [resolvable:$true] %s59_s17 }
  0x36   :  { %p691_p11 = scmp.lt.u32.totalorder %s687_s21, %s901_s5 }
  0x38   :  { %p693_p12 = pnand %p691_p11, %p688_p10 }
  0x3a   :  { %696 = shalt.err (!%p693_p12)
}
  0x3b   :  { %s697_s1 = scalar_lea.vmem %s60_s17, 1024  ;;  %p702_p0 = scmp.lt.s32.totalorder %s60_s17, %s60_s17 }
  0x3c   :  { %p698_p13 = scmp.ne.s32.totalorder %s60_s17, %s697_s1  ;;  %p703_p1 = scmp.lt.s32.totalorder %s697_s1, %s697_s1 }
  0x3e   :  { %p704_p2 = por %p703_p1, %p702_p0 }
  0x40   :  { %p705_p3 = pnand %p704_p2, %p698_p13 }
  0x42   :  { %708 = shalt.err (!%p705_p3)
}
  0x43   :  { %65 = dma.hbm_to_vmem [thread:$0]  %s901_s5, 1024, %s60_s17, [#allocation9], %s740_s11, %s740_s11, %s741_s12  }
  0x44   :  { %731 = dma.done.wait [#allocation3], 64  }
  0x45   :  { %732 = vsyncadd [#allocation3], 4294967232 }
  0x46   :  { %733 = dma.done.wait [#allocation6], 2048  }
  0x47   :  { %734 = vsyncadd [#allocation6], 4294965248 }
  0x48   :  { %735 = dma.done.wait [#allocation9], 1024  }
  0x49   :  { %736 = vsyncadd [#allocation9], 4294966272  ;;  %v745_v0 = vmov 0.0   ;;  %vm746_vm0 = vmmov 0   ;;  %v585_v1 = vld [vmem:[#allocation5] sm:$0xff]   ;;  %v586_v2 = vld [vmem:[#allocation5 + $0x8] sm:$0xff]   ;;  %v429_v48 = vlaneseq }
  0x4a   :  { %516 = vmatprep.subr.bf16.mxu0 %v745_v0  ;;  %532 = vmatprep.mubr.msk.bf16.mxu0 %vm746_vm0, %v745_v0  ;;  %v587_v3 = vld [vmem:[#allocation5 + $0x10] sm:$0xff]   ;;  %v588_v4 = vld [vmem:[#allocation5 + $0x18] sm:$0xff]   ;;  %v589_v5 = vld [vmem:[#allocation5 + $0x20] sm:$0xff]  }
  0x4b   :  { %536 = vmatprep.subr.bf16.mxu1 %v745_v0  ;;  %552 = vmatprep.mubr.msk.bf16.mxu1 %vm746_vm0, %v745_v0  ;;  %v590_v6 = vld [vmem:[#allocation5 + $0x28] sm:$0xff]   ;;  %v591_v7 = vld [vmem:[#allocation5 + $0x30] sm:$0xff]   ;;  %v592_v8 = vld [vmem:[#allocation5 + $0x38] sm:$0xff]   ;;  %v430_v49 = vand.u32 127, %v429_v48 }
  0x4c   :  { %517 = vmatpush3.bf16.msra.mxu0 %v585_v1  ;;  %v81_v9 = vld [vmem:[#allocation2] sm:$0xf]  ;;  %v593_v10 = vld [vmem:[#allocation7] sm:$0xff]   ;;  %v594_v11 = vld [vmem:[#allocation7 + $0x8] sm:$0xff]  }
  0x4d   :  { %518 = vmatprep.subr.bf16.mxu0 %v745_v0  ;;  %537 = vmatpush3.bf16.msra.mxu1 %v593_v10  ;;  %v595_v12 = vld [vmem:[#allocation7 + $0x10] sm:$0xff]   ;;  %v596_v13 = vld [vmem:[#allocation7 + $0x18] sm:$0xff]   ;;  %v597_v14 = vld [vmem:[#allocation7 + $0x20] sm:$0xff]   ;;  %vm431_vm1 = vcmp.lt.s32.totalorder %v430_v49, 16 }
  0x4e   :  { %538 = vmatprep.subr.bf16.mxu1 %v745_v0  ;;  %v598_v15 = vld [vmem:[#allocation7 + $0x28] sm:$0xff]   ;;  %v599_v16 = vld [vmem:[#allocation7 + $0x30] sm:$0xff]   ;;  %v600_v17 = vld [vmem:[#allocation7 + $0x38] sm:$0xff]  }
  0x4f   :  { %v460_v18 = vld [vmem:[%s898_s2] ss:$0 sm:$0xff]  ;;  %v601_v29 = vld [vmem:[#allocation8] sm:$0xff]   ;;  %v602_v30 = vld [vmem:[#allocation8 + $0x8] sm:$0xff]  }
  0x50   :  { %519 = vmatpush3.bf16.msra.mxu0 %v586_v2  ;;  %v603_v31 = vld [vmem:[#allocation8 + $0x10] sm:$0xff]   ;;  %v604_v32 = vld [vmem:[#allocation8 + $0x18] sm:$0xff]   ;;  %v605_v33 = vld [vmem:[#allocation8 + $0x20] sm:$0xff]  }
  0x51   :  { %520 = vmatprep.subr.bf16.mxu0 %v745_v0  ;;  %539 = vmatpush3.bf16.msra.mxu1 %v594_v11  ;;  %v606_v34 = vld [vmem:[#allocation8 + $0x28] sm:$0xff]   ;;  %v607_v35 = vld [vmem:[#allocation8 + $0x30] sm:$0xff]   ;;  %v608_v36 = vld [vmem:[#allocation8 + $0x38] sm:$0xff]  }
  0x52   :  { %540 = vmatprep.subr.bf16.mxu1 %v745_v0  ;;  %v470_v37 = vld [vmem:[%s900_s4] ss:$0 sm:$0xff]  ;;  %s747_s4 = smov [#allocation10]  }
  0x53   :  { %v480_v50 = vld [vmem:[%s902_s6] ss:$0 sm:$0xff]  ;;  %s449_s28 = sshll.u32 %s747_s4, 4  ;;  %s450_s28 = int_to_ptr.vmem [resolvable:$true] %s449_s28 }
  0x54   :  { %521 = vmatpush3.bf16.msra.mxu0 %v587_v3  ;;  %s709_s6 = scalar_lea.vmem %s450_s28, 128  ;;  %p714_p5 = scmp.lt.s32.totalorder %s450_s28, %s450_s28 }
  0x55   :  { %522 = vmatprep.subr.bf16.mxu0 %v745_v0  ;;  %541 = vmatpush3.bf16.msra.mxu1 %v595_v12  ;;  %p710_p4 = scmp.ne.s32.totalorder %s450_s28, %s709_s6  ;;  %p715_p6 = scmp.lt.s32.totalorder %s709_s6, %s709_s6 }
  0x56   :  { %542 = vmatprep.subr.bf16.mxu1 %v745_v0 }
  0x57   :  { %p716_p7 = por %p715_p6, %p714_p5 }
  0x58   :  { %523 = vmatpush3.bf16.msra.mxu0 %v588_v4 }
  0x59   :  { %524 = vmatprep.subr.bf16.mxu0 %v745_v0  ;;  %543 = vmatpush3.bf16.msra.mxu1 %v596_v13  ;;  %p717_p8 = pnand %p716_p7, %p710_p4 }
  0x5a   :  { %544 = vmatprep.subr.bf16.mxu1 %v745_v0 }
  0x5c   :  { %525 = vmatpush3.bf16.msra.mxu0 %v589_v5 }
  0x5d   :  { %526 = vmatprep.subr.bf16.mxu0 %v745_v0  ;;  %545 = vmatpush3.bf16.msra.mxu1 %v597_v14 }
  0x5e   :  { %546 = vmatprep.subr.bf16.mxu1 %v745_v0 }
  0x60   :  { %527 = vmatpush3.bf16.msra.mxu0 %v590_v6 }
  0x61   :  { %528 = vmatprep.subr.bf16.mxu0 %v745_v0  ;;  %547 = vmatpush3.bf16.msra.mxu1 %v598_v15 }
  0x62   :  { %548 = vmatprep.subr.bf16.mxu1 %v745_v0 }
  0x64   :  { %529 = vmatpush3.bf16.msra.mxu0 %v591_v7 }
  0x65   :  { %530 = vmatprep.subr.bf16.mxu0 %v745_v0  ;;  %549 = vmatpush3.bf16.msra.mxu1 %v599_v16 }
  0x66   :  { %550 = vmatprep.subr.bf16.mxu1 %v745_v0 }
  0x68   :  { %531 = vmatpush3.bf16.msra.mxu0 %v592_v8 }
  0x69   :  { %556 = vmatprep.subr.bf16.mxu0 %v745_v0  ;;  %551 = vmatpush3.bf16.msra.mxu1 %v600_v17 }
  0x6b   :  { %533 = vmatmul.mubr.bf16.vlgmr.msra.gmra.mrb[0].mxu0 %v81_v9 }
  0x6c   :  { %572 = vmatprep.mubr.msk.bf16.mxu0 %vm746_vm0, %v745_v0  ;;  %557 = vmatpush3.bf16.msra.mxu0 %v601_v29 }
  0x6d   :  { %558 = vmatprep.subr.bf16.mxu0 %v745_v0 }
  0x70   :  { %559 = vmatpush3.bf16.msra.mxu0 %v602_v30 }
  0x71   :  { %560 = vmatprep.subr.bf16.mxu0 %v745_v0 }
  0x74   :  { %561 = vmatpush3.bf16.msra.mxu0 %v603_v31 }
  0x75   :  { %562 = vmatprep.subr.bf16.mxu0 %v745_v0 }
  0x78   :  { %563 = vmatpush3.bf16.msra.mxu0 %v604_v32 }
  0x79   :  { %564 = vmatprep.subr.bf16.mxu0 %v745_v0 }
  0x7c   :  { %565 = vmatpush3.bf16.msra.mxu0 %v605_v33 }
  0x7d   :  { %566 = vmatprep.subr.bf16.mxu0 %v745_v0 }
  0x80   :  { %567 = vmatpush3.bf16.msra.mxu0 %v606_v34 }
  0x81   :  { %568 = vmatprep.subr.bf16.mxu0 %v745_v0 }
  0x84   :  { %569 = vmatpush3.bf16.msra.mxu0 %v607_v35 }
  0x85   :  { %570 = vmatprep.subr.bf16.mxu0 %v745_v0 }
  0x88   :  { %571 = vmatpush3.bf16.msra.mxu0 %v608_v36 }
 0x13e   :  { %v187_v19 = vpop.f32.mrb[0].mxu0 }
 0x13f   :  { %v188_v20 = vadd.f32 %v460_v18, %v187_v19  ;;  %v534_v21 = vpop.f32.mrb[1].mxu0 }
 0x140   :  { %v190_v22 = vpop.f32.mrb[2].mxu0 }
 0x141   :  { %v469_v23 = vmul.f32 -1.442695, %v188_v20  ;;  %v535_v24 = vpop.f32.mrb[3].mxu0 }
 0x143   :  { %609 = vpow2.f32 %v469_v23 }
 0x14d   :  { %v610_v25 = vpop.eup %609 }
 0x14e   :  { %v196_v26 = vadd.f32 1.0, %v610_v25 }
 0x150   :  { %611 = vrcp.f32 %v196_v26 }
 0x15a   :  { %v612_v27 = vpop.eup %611 }
 0x15b   :  { %v199_v28 = vpack.c.bf16 %v612_v27, %v612_v27 }
 0x15d   :  { %553 = vmatmul.mubr.bf16.vlgmr.msra.gmra.mrb[0].mxu1 %v199_v28 }
 0x230   :  { %v305_v38 = vpop.f32.mrb[0].mxu1 }
 0x231   :  { %v306_v39 = vadd.f32 %v470_v37, %v305_v38  ;;  %v554_v40 = vpop.f32.mrb[1].mxu1 }
 0x232   :  { %v308_v41 = vpop.f32.mrb[2].mxu1 }
 0x233   :  { %v479_v42 = vmul.f32 -1.442695, %v306_v39  ;;  %v555_v43 = vpop.f32.mrb[3].mxu1 }
 0x235   :  { %613 = vpow2.f32 %v479_v42 }
 0x23f   :  { %v614_v44 = vpop.eup %613 }
 0x240   :  { %v314_v45 = vadd.f32 1.0, %v614_v44 }
 0x242   :  { %615 = vrcp.f32 %v314_v45 }
 0x24c   :  { %v616_v46 = vpop.eup %615 }
 0x24d   :  { %v317_v47 = vpack.c.bf16 %v616_v46, %v616_v46 }
 0x24f   :  { %573 = vmatmul.mubr.bf16.vlgmr.msra.gmra.mrb[4].mxu0 %v317_v47 }
 0x322   :  { %v423_v51 = vpop.f32.mrb[4].mxu0 }
 0x323   :  { %v424_v52 = vadd.f32 %v480_v50, %v423_v51  ;;  %v574_v53 = vpop.f32.mrb[5].mxu0 }
 0x324   :  { %v426_v54 = vpop.f32.mrb[6].mxu0 }
 0x325   :  { %v575_v55 = vpop.f32.mrb[7].mxu0  ;;  %v432_v56 = vsel %vm431_vm1, %v424_v52, -inf }
 0x326   :  { %433 = vmax.xlane.f32.xlu0 %v432_v56 }
 0x3b3   :  { %v434_v57 = vpop.xlane.xlu0 %433 }
 0x3b4   :  { %v435_v58 = vsub.f32 %v432_v56, %v434_v57 }
 0x3b6   :  { %v436_v59 = vmul.f32 1.442695, %v435_v58 }
 0x3b8   :  { %617 = vpow2.f32 %v436_v59 }
 0x3c2   :  { %v618_v60 = vpop.eup %617 }
 0x3c3   :  { %438 = vadd.xlane.f32.xlu0 %v618_v60 }
 0x450   :  { %v439_v61 = vpop.xlane.xlu0 %438 }
 0x451   :  { %619 = vrcp.f32 %v439_v61 }
 0x45b   :  { %v620_v62 = vpop.eup %619 }
 0x45c   :  { %v441_v63 = vmul.f32 %v620_v62, %v618_v60 }
 0x45e   :  { %442 = vst [vmem:[#allocation10] sm:$0xff] %v441_v63 }
 0x45f   :  { %720 = shalt.err (!%p717_p8)
}
 0x460   :  { %s721_s8 = scalar_lea.hbm %s903_s7, 128 }
 0x461   :  { %p722_p9 = scmp.ne.s32.totalorder %s903_s7, %s721_s8  ;;  %p725_p10 = scmp.lt.u32.totalorder %s721_s8, %s903_s7 }
 0x463   :  { %p727_p11 = pnand %p725_p10, %p722_p9 }
 0x465   :  { %730 = shalt.err (!%p727_p11)
}
 0x466   :  { %452 = dma.vmem_to_hbm [thread:$0]  %s450_s28, 128, %s903_s7, [#allocation4]  }
 0x467   :  { %737 = dma.done.wait [#allocation4], 128  }
 0x468   :  { %738 = vsyncadd [#allocation4], 4294967168 }
 0x469   :  { %456 = vsyncpa [#allocation3], 1 }
 0x46a   :  { %457 = vsyncpa [#allocation6], 1 }
 0x46b   :  { %458 = vsyncpa [#allocation9], 1 }
 0x46c   :  { %459 = vsyncpa [#allocation4], 1 }

</bundles_post_ra>
